<compile_context>
chip_gen: v7x
topology: tpu7x:2x2x1
jax: 0.10.0
libtpu: 0.0.40
codegen_flags: <defaults>
</compile_context>

<pallas_src>
import functools

import jax
import jax.numpy as jnp
from jax.experimental import pallas as pl
from jax.experimental.pallas import tpu as pltpu

LN_EPS = 1e-5
NEG_BIG = -1e30   # finite "-inf": masked lanes / initial max never produce inf-inf NaNs


def _round_up(x, m):
    return ((x + m - 1) // m) * m


def _round_down(x, m):
    return (x // m) * m


def _attention_kernel(q_ref, w_ref, prm_ref, k_ref, v_ref, o_ref,
                      h_sc, m_sc, l_sc, acc_sc, *, seq_len, block_s):
    # q_ref : (TB, Din)      w_ref : (Din, H)      prm_ref : (3, H)  [bias; gamma; beta]
    # k_ref : (TB, TS, H)    v_ref : (TB, TS, H)   o_ref   : (TB, H)
    # h_sc  : (TB, H) f32    m_sc/l_sc : (TB, 1) f32        acc_sc  : (TB, H) f32
    si = pl.program_id(1)
    ns = pl.num_programs(1)

    @pl.when(si == 0)
    def _init():
        # Linear projection (MXU) + LayerNorm, computed once per batch tile.
        q = q_ref[...].astype(jnp.float32)
        w = w_ref[...].astype(jnp.float32)
        h = jnp.dot(q, w, preferred_element_type=jnp.float32) + prm_ref[0:1, :]
        mu = jnp.mean(h, axis=-1, keepdims=True)
        c = h - mu
        var = jnp.mean(c * c, axis=-1, keepdims=True)
        hn = c * jax.lax.rsqrt(var + LN_EPS)
        h_sc[...] = hn * prm_ref[1:2, :] + prm_ref[2:3, :]
        # Online-softmax running state.
        m_sc[...] = jnp.full(m_sc.shape, NEG_BIG, jnp.float32)
        l_sc[...] = jnp.zeros(l_sc.shape, jnp.float32)
        acc_sc[...] = jnp.zeros(acc_sc.shape, jnp.float32)

    h = h_sc[...]                                            # (TB, H) f32
    k = k_ref[...].astype(jnp.float32)                       # upcast after DMA (v5e-safe)
    v = v_ref[...].astype(jnp.float32)

    # scores[b, s] = h[b] . k[b, s] -- VPU broadcast-multiply + lane reduce (no transpose).
    scores = jnp.sum(h[:, None, :] * k, axis=-1)             # (TB, TS)

    if seq_len % block_s != 0:
        # Partial last sequence tile: mask invalid positions, and zero the matching V
        # rows so out-of-bounds garbage (possibly NaN) cannot leak into valid rows.
        pos = si * block_s + jax.lax.broadcasted_iota(jnp.int32, (1, block_s), 1)
        valid = pos < seq_len                                 # (1, TS)
        scores = jnp.where(valid, scores, NEG_BIG)
        v = jnp.where(valid[:, :, None], v, 0.0)

    # Streaming (online) softmax update.
    m_prev = m_sc[...]
    m_new = jnp.maximum(m_prev, jnp.max(scores, axis=-1, keepdims=True))
    alpha = jnp.exp(m_prev - m_new)
    p = jnp.exp(scores - m_new)                               # (TB, TS)
    l_sc[...] = alpha * l_sc[...] + jnp.sum(p, axis=-1, keepdims=True)
    acc_sc[...] = alpha * acc_sc[...] + jnp.sum(p[:, :, None] * v, axis=1)
    m_sc[...] = m_new

    @pl.when(si == ns - 1)
    def _finalize():
        inv_l = pl.reciprocal(l_sc[...], approx=True)         # EUP slot, ~free
        o_ref[...] = (acc_sc[...] * inv_l).astype(o_ref.dtype)


def _choose_tiles(B, S, H, Din, kv_itemsize, vmem_budget):
    """Pick (TB, TS) so the double-buffered pipeline fits in `vmem_budget` bytes."""
    F32 = 4

    def fits(tb, ts):
        kv = 2 * 2 * tb * ts * H * kv_itemsize           # K + V tiles, double-buffered
        tmp = 2 * tb * ts * H * F32                      # broadcast-multiply temporaries
        io = 2 * tb * (Din + H) * F32                    # query + output tiles
        wp = 2 * (Din * H + 3 * H) * F32                 # weight + packed params
        sc = tb * (2 * max(H, 128) + 2 * 128) * F32      # h/acc + m/l scratch (lane-padded)
        return kv + tmp + io + wp + sc <= vmem_budget

    # Sequence tile: full S when small (block == full dim is allowed), else a
    # multiple-of-8 chunk.
    TS = S if S <= 512 else 512

    # Batch tile: full B when tiny, otherwise a multiple of 8 sized to the budget.
    if B <= 8:
        TB = B
    else:
        TB = max(8, _round_down(min(256, _round_up(B, 8)), 8))
        if B >= 16:
            # Keep >= 2 batch grid steps so v7x's two TensorCores both get work.
            TB = min(TB, max(8, _round_down(_round_up(B, 8) // 2, 8)))
        while TB > 8 and not fits(TB, TS):
            TB = max(8, _round_down(TB // 2, 8))
    while TS > 8 and not fits(TB, TS):
        TS = max(8, _round_down(TS // 2, 8))
    return TB, TS


def simple_attention(query, key, value, w, b, gamma, beta, *,
                     block_b=None, block_s=None):
    """query [B, Din], key/value [B, S, H] (f32 or bf16), w [Din, H], b/gamma/beta [H] -> [B, H]."""
    B, Din = query.shape
    Bk, S, H = key.shape
    assert Bk == B and value.shape == key.shape
    assert w.shape == (Din, H)

    # Per-core VMEM budget (v5e/v6e: 128 MiB, v7x: 64 MiB).  Fall back conservatively.
    try:
        vmem_cap = int(pltpu.get_tpu_info().vmem_capacity_bytes)
    except Exception:
        vmem_cap = 64 * 1024 * 1024
    vmem_budget = int(vmem_cap * 0.55)
    vmem_limit = max(32 * 1024 * 1024, int(vmem_cap * 0.8))

    kv_itemsize = jnp.dtype(key.dtype).itemsize
    TB, TS = _choose_tiles(B, S, H, Din, kv_itemsize, vmem_budget)
    if block_b is not None:
        TB = block_b
    if block_s is not None:
        TS = block_s

    nb = pl.cdiv(B, TB)
    ns = pl.cdiv(S, TS)

    # Pad only the (tiny) query so all output stores are in-bounds; K/V tails use
    # Pallas partial blocks (garbage rows are row-independent and discarded below).
    Bp = nb * TB
    if Bp != B:
        query = jnp.pad(query, ((0, Bp - B), (0, 0)))

    params = jnp.stack([b.astype(jnp.float32),
                        gamma.astype(jnp.float32),
                        beta.astype(jnp.float32)], axis=0)          # (3, H)

    kernel = functools.partial(_attention_kernel, seq_len=S, block_s=TS)

    out = pl.pallas_call(
        kernel,
        out_shape=jax.ShapeDtypeStruct((Bp, H), query.dtype),
        grid_spec=pltpu.PrefetchScalarGridSpec(
            num_scalar_prefetch=0,
            grid=(nb, ns),
            in_specs=[
                pl.BlockSpec((TB, Din), lambda i, s: (i, 0)),        # query tile
                pl.BlockSpec((Din, H), lambda i, s: (0, 0)),         # linear weight
                pl.BlockSpec((3, H), lambda i, s: (0, 0)),           # [bias; gamma; beta]
                pl.BlockSpec((TB, TS, H), lambda i, s: (i, s, 0)),   # key tile
                pl.BlockSpec((TB, TS, H), lambda i, s: (i, s, 0)),   # value tile
            ],
            out_specs=pl.BlockSpec((TB, H), lambda i, s: (i, 0)),
            scratch_shapes=[
                pltpu.VMEM((TB, H), jnp.float32),    # h = LayerNorm(Linear(query))
                pltpu.VMEM((TB, 1), jnp.float32),    # running max
                pltpu.VMEM((TB, 1), jnp.float32),    # running denominator
                pltpu.VMEM((TB, H), jnp.float32),    # running weighted sum of V
            ],
        ),
        compiler_params=pltpu.CompilerParams(
            dimension_semantics=("parallel", "arbitrary"),
            vmem_limit_bytes=vmem_limit,
        ),
    )(query, w, params, key, value)

    return out[:B]


def _reference(query, key, value, w, b, gamma, beta):
    h = query.astype(jnp.float32) @ w.astype(jnp.float32) + b
    mu = jnp.mean(h, axis=-1, keepdims=True)
    var = jnp.mean((h - mu) ** 2, axis=-1, keepdims=True)
    h = (h - mu) / jnp.sqrt(var + LN_EPS) * gamma + beta
    scores = jnp.einsum("bh,bsh->bs", h, key.astype(jnp.float32))
    p = jax.nn.softmax(scores, axis=-1)
    return jnp.einsum("bs,bsh->bh", p, value.astype(jnp.float32))


def _run_case(rng, B, Din, H, S, **kw):
    k_q, k_k, k_v, k_w, k_b = jax.random.split(rng, 5)
    query = jax.random.normal(k_q, (B, Din), dtype=jnp.float32)
    key_t = jax.random.normal(k_k, (B, S, H), dtype=jnp.float32)
    value = jax.random.normal(k_v, (B, S, H), dtype=jnp.float32)

    bound = 1.0 / (Din ** 0.5)
    w = jax.random.uniform(k_w, (Din, H), jnp.float32, -bound, bound)
    b = jax.random.uniform(k_b, (H,), jnp.float32, -bound, bound)
    gamma = jnp.ones((H,), jnp.float32)
    beta = jnp.zeros((H,), jnp.float32)

    out = jax.block_until_ready(
        simple_attention(query, key_t, value, w, b, gamma, beta, **kw))
    ref = _reference(query, key_t, value, w, b, gamma, beta)
    assert out.shape == (B, H)
    assert jnp.allclose(out, ref, atol=5e-3, rtol=5e-3), (
        f"mismatch vs reference (max abs err {jnp.max(jnp.abs(out - ref))})")


if __name__ == "__main__":
    root = jax.random.PRNGKey(0)
    r1, r2, r3 = jax.random.split(root, 3)

    # 1) Module-sized example (single tile; blocks equal the full array dims).
    _run_case(r1, B=2, Din=16, H=32, S=8)

    # 2) Multi-step online softmax across batch and sequence tiles (exact tiling).
    _run_case(r2, B=16, Din=32, H=128, S=64, block_b=8, block_s=16)

    # 3) Ragged shapes: batch padding + partial K/V blocks + sequence-tail masking.
    _run_case(r3, B=10, Din=16, H=32, S=20, block_b=8, block_s=8)

    print("KERNEL_OK")
</pallas_src>

<mosaic_0001>
module attributes {stable_mosaic.version = 11 : i64} {
  func.func @_attention_kernel(%arg0: i32, %arg1: i32, %arg2: memref<2x16xf32, #tpu.memory_space<vmem>>, %arg3: memref<16x32xf32, #tpu.memory_space<vmem>>, %arg4: memref<3x32xf32, #tpu.memory_space<vmem>>, %arg5: memref<2x8x32xf32, #tpu.memory_space<vmem>>, %arg6: memref<2x8x32xf32, #tpu.memory_space<vmem>>, %arg7: memref<2x32xf32, #tpu.memory_space<vmem>>, %arg8: memref<2x32xf32, #tpu.memory_space<vmem>>, %arg9: memref<2x1xf32, #tpu.memory_space<vmem>>, %arg10: memref<2x1xf32, #tpu.memory_space<vmem>>, %arg11: memref<2x32xf32, #tpu.memory_space<vmem>>) attributes {dimension_semantics = [#tpu.dimension_semantics<parallel>, #tpu.dimension_semantics<arbitrary>], iteration_bounds = array<i64: 1, 1>, scalar_prefetch = 0 : i64, scratch_operands = 4 : i64, tpu.core_type = #tpu.core_type<tc>, window_params = [{transform_indices = @transform_0, window_bounds = array<i64: 2, 16>}, {pipeline_mode = #tpu.pipeline_mode<synchronous>, transform_indices = @transform_1, window_bounds = array<i64: 16, 32>}, {pipeline_mode = #tpu.pipeline_mode<synchronous>, transform_indices = @transform_2, window_bounds = array<i64: 3, 32>}, {transform_indices = @transform_3, window_bounds = array<i64: 2, 8, 32>}, {transform_indices = @transform_4, window_bounds = array<i64: 2, 8, 32>}, {transform_indices = @transform_5, window_bounds = array<i64: 2, 32>}]} {
    %c0_i32 = arith.constant 0 : i32
    %0 = arith.cmpi eq, %arg1, %c0_i32 : i32
    %1 = arith.extui %0 : i1 to i32
    %c0_i32_0 = arith.constant 0 : i32
    %2 = arith.cmpi ne, %1, %c0_i32_0 : i32
    scf.if %2 {
      %c0_25 = arith.constant 0 : index
      %c0_26 = arith.constant 0 : index
      %38 = vector.load %arg2[%c0_25, %c0_26] : memref<2x16xf32, #tpu.memory_space<vmem>>, vector<2x16xf32>
      %c0_27 = arith.constant 0 : index
      %c0_28 = arith.constant 0 : index
      %39 = vector.load %arg3[%c0_27, %c0_28] : memref<16x32xf32, #tpu.memory_space<vmem>>, vector<16x32xf32>
      %cst_29 = arith.constant dense<0.000000e+00> : vector<2x32xf32>
      %40 = tpu.matmul %38, %39, %cst_29 {dimension_numbers = #tpu.dot_dimension_numbers<[1], [0], [0], [1], [0, 0, 1, 1], [], []>} : vector<2x16xf32>, vector<16x32xf32>, vector<2x32xf32> -> vector<2x32xf32>
      %c0_30 = arith.constant 0 : index
      %c0_31 = arith.constant 0 : index
      %41 = vector.load %arg4[%c0_30, %c0_31] : memref<3x32xf32, #tpu.memory_space<vmem>>, vector<1x32xf32>
      %42 = vector.broadcast %41 : vector<1x32xf32> to vector<2x32xf32>
      %43 = arith.addf %40, %42 : vector<2x32xf32>
      %cst_32 = arith.constant dense<0.000000e+00> : vector<2xf32>
      %44 = vector.multi_reduction <add>, %43, %cst_32 [1] : vector<2x32xf32> to vector<2xf32>
      %45 = vector.shape_cast %44 : vector<2xf32> to vector<2x1xf32>
      %cst_33 = arith.constant 3.200000e+01 : f32
      %46 = vector.broadcast %cst_33 : f32 to vector<2x1xf32>
      %47 = arith.divf %45, %46 : vector<2x1xf32>
      %48 = vector.broadcast %47 : vector<2x1xf32> to vector<2x32xf32>
      %49 = arith.subf %43, %48 : vector<2x32xf32>
      %50 = arith.mulf %49, %49 : vector<2x32xf32>
      %cst_34 = arith.constant dense<0.000000e+00> : vector<2xf32>
      %51 = vector.multi_reduction <add>, %50, %cst_34 [1] : vector<2x32xf32> to vector<2xf32>
      %52 = vector.shape_cast %51 : vector<2xf32> to vector<2x1xf32>
      %cst_35 = arith.constant 3.200000e+01 : f32
      %53 = vector.broadcast %cst_35 : f32 to vector<2x1xf32>
      %54 = arith.divf %52, %53 : vector<2x1xf32>
      %cst_36 = arith.constant 9.99999974E-6 : f32
      %55 = vector.broadcast %cst_36 : f32 to vector<2x1xf32>
      %56 = arith.addf %54, %55 : vector<2x1xf32>
      %57 = math.rsqrt %56 : vector<2x1xf32>
      %58 = vector.broadcast %57 : vector<2x1xf32> to vector<2x32xf32>
      %59 = arith.mulf %49, %58 : vector<2x32xf32>
      %c1 = arith.constant 1 : index
      %c0_37 = arith.constant 0 : index
      %60 = vector.load %arg4[%c1, %c0_37] : memref<3x32xf32, #tpu.memory_space<vmem>>, vector<1x32xf32>
      %61 = vector.broadcast %60 : vector<1x32xf32> to vector<2x32xf32>
      %62 = arith.mulf %59, %61 : vector<2x32xf32>
      %c2 = arith.constant 2 : index
      %c0_38 = arith.constant 0 : index
      %63 = vector.load %arg4[%c2, %c0_38] : memref<3x32xf32, #tpu.memory_space<vmem>>, vector<1x32xf32>
      %64 = vector.broadcast %63 : vector<1x32xf32> to vector<2x32xf32>
      %65 = arith.addf %62, %64 : vector<2x32xf32>
      %c0_39 = arith.constant 0 : index
      %c0_40 = arith.constant 0 : index
      %66 = vector.load %arg8[%c0_39, %c0_40] : memref<2x32xf32, #tpu.memory_space<vmem>>, vector<2x32xf32>
      tpu.vector_store %arg8[%c0_39, %c0_40], %65 {strides = array<i32>} : memref<2x32xf32, #tpu.memory_space<vmem>>, vector<2x32xf32>,
      %cst_41 = arith.constant -1.000000e+30 : f32
      %67 = vector.broadcast %cst_41 : f32 to vector<2x1xf32>
      %c0_42 = arith.constant 0 : index
      %c0_43 = arith.constant 0 : index
      %68 = vector.load %arg9[%c0_42, %c0_43] : memref<2x1xf32, #tpu.memory_space<vmem>>, vector<2x1xf32>
      tpu.vector_store %arg9[%c0_42, %c0_43], %67 {strides = array<i32>} : memref<2x1xf32, #tpu.memory_space<vmem>>, vector<2x1xf32>,
      %cst_44 = arith.constant 0.000000e+00 : f32
      %69 = vector.broadcast %cst_44 : f32 to vector<2x1xf32>
      %c0_45 = arith.constant 0 : index
      %c0_46 = arith.constant 0 : index
      %70 = vector.load %arg10[%c0_45, %c0_46] : memref<2x1xf32, #tpu.memory_space<vmem>>, vector<2x1xf32>
      tpu.vector_store %arg10[%c0_45, %c0_46], %69 {strides = array<i32>} : memref<2x1xf32, #tpu.memory_space<vmem>>, vector<2x1xf32>,
      %cst_47 = arith.constant 0.000000e+00 : f32
      %71 = vector.broadcast %cst_47 : f32 to vector<2x32xf32>
      %c0_48 = arith.constant 0 : index
      %c0_49 = arith.constant 0 : index
      %72 = vector.load %arg11[%c0_48, %c0_49] : memref<2x32xf32, #tpu.memory_space<vmem>>, vector<2x32xf32>
      tpu.vector_store %arg11[%c0_48, %c0_49], %71 {strides = array<i32>} : memref<2x32xf32, #tpu.memory_space<vmem>>, vector<2x32xf32>,
    } else {
    }
    %c0 = arith.constant 0 : index
    %c0_1 = arith.constant 0 : index
    %3 = vector.load %arg8[%c0, %c0_1] : memref<2x32xf32, #tpu.memory_space<vmem>>, vector<2x32xf32>
    %c0_2 = arith.constant 0 : index
    %c0_3 = arith.constant 0 : index
    %c0_4 = arith.constant 0 : index
    %4 = vector.load %arg5[%c0_2, %c0_3, %c0_4] : memref<2x8x32xf32, #tpu.memory_space<vmem>>, vector<2x8x32xf32>
    %c0_5 = arith.constant 0 : index
    %c0_6 = arith.constant 0 : index
    %c0_7 = arith.constant 0 : index
    %5 = vector.load %arg6[%c0_5, %c0_6, %c0_7] : memref<2x8x32xf32, #tpu.memory_space<vmem>>, vector<2x8x32xf32>
    %6 = vector.shape_cast %3 : vector<2x32xf32> to vector<2x1x32xf32>
    %7 = vector.broadcast %6 : vector<2x1x32xf32> to vector<2x8x32xf32>
    %8 = arith.mulf %7, %4 : vector<2x8x32xf32>
    %cst = arith.constant dense<0.000000e+00> : vector<2x8xf32>
    %9 = vector.multi_reduction <add>, %8, %cst [2] : vector<2x8x32xf32> to vector<2x8xf32>
    %c0_8 = arith.constant 0 : index
    %c0_9 = arith.constant 0 : index
    %10 = vector.load %arg9[%c0_8, %c0_9] : memref<2x1xf32, #tpu.memory_space<vmem>>, vector<2x1xf32>
    %cst_10 = arith.constant dense<0xFF800000> : vector<2xf32>
    %11 = vector.multi_reduction <maximumf>, %9, %cst_10 [1] : vector<2x8xf32> to vector<2xf32>
    %12 = vector.shape_cast %11 : vector<2xf32> to vector<2x1xf32>
    %13 = arith.maximumf %10, %12 : vector<2x1xf32>
    %14 = arith.subf %10, %13 : vector<2x1xf32>
    %15 = math.exp %14 : vector<2x1xf32>
    %16 = vector.broadcast %13 : vector<2x1xf32> to vector<2x8xf32>
    %17 = arith.subf %9, %16 : vector<2x8xf32>
    %18 = math.exp %17 : vector<2x8xf32>
    %c0_11 = arith.constant 0 : index
    %c0_12 = arith.constant 0 : index
    %19 = vector.load %arg10[%c0_11, %c0_12] : memref<2x1xf32, #tpu.memory_space<vmem>>, vector<2x1xf32>
    %20 = arith.mulf %15, %19 : vector<2x1xf32>
    %cst_13 = arith.constant dense<0.000000e+00> : vector<2xf32>
    %21 = vector.multi_reduction <add>, %18, %cst_13 [1] : vector<2x8xf32> to vector<2xf32>
    %22 = vector.shape_cast %21 : vector<2xf32> to vector<2x1xf32>
    %23 = arith.addf %20, %22 : vector<2x1xf32>
    %c0_14 = arith.constant 0 : index
    %c0_15 = arith.constant 0 : index
    %24 = vector.load %arg10[%c0_14, %c0_15] : memref<2x1xf32, #tpu.memory_space<vmem>>, vector<2x1xf32>
    tpu.vector_store %arg10[%c0_14, %c0_15], %23 {strides = array<i32>} : memref<2x1xf32, #tpu.memory_space<vmem>>, vector<2x1xf32>,
    %c0_16 = arith.constant 0 : index
    %c0_17 = arith.constant 0 : index
    %25 = vector.load %arg11[%c0_16, %c0_17] : memref<2x32xf32, #tpu.memory_space<vmem>>, vector<2x32xf32>
    %26 = vector.broadcast %15 : vector<2x1xf32> to vector<2x32xf32>
    %27 = arith.mulf %26, %25 : vector<2x32xf32>
    %28 = vector.shape_cast %18 : vector<2x8xf32> to vector<2x8x1xf32>
    %29 = vector.broadcast %28 : vector<2x8x1xf32> to vector<2x8x32xf32>
    %30 = arith.mulf %29, %5 : vector<2x8x32xf32>
    %cst_18 = arith.constant dense<0.000000e+00> : vector<2x32xf32>
    %31 = vector.multi_reduction <add>, %30, %cst_18 [1] : vector<2x8x32xf32> to vector<2x32xf32>
    %32 = arith.addf %27, %31 : vector<2x32xf32>
    %c0_19 = arith.constant 0 : index
    %c0_20 = arith.constant 0 : index
    %33 = vector.load %arg11[%c0_19, %c0_20] : memref<2x32xf32, #tpu.memory_space<vmem>>, vector<2x32xf32>
    tpu.vector_store %arg11[%c0_19, %c0_20], %32 {strides = array<i32>} : memref<2x32xf32, #tpu.memory_space<vmem>>, vector<2x32xf32>,
    %c0_21 = arith.constant 0 : index
    %c0_22 = arith.constant 0 : index
    %34 = vector.load %arg9[%c0_21, %c0_22] : memref<2x1xf32, #tpu.memory_space<vmem>>, vector<2x1xf32>
    tpu.vector_store %arg9[%c0_21, %c0_22], %13 {strides = array<i32>} : memref<2x1xf32, #tpu.memory_space<vmem>>, vector<2x1xf32>,
    %c0_i32_23 = arith.constant 0 : i32
    %35 = arith.cmpi eq, %arg1, %c0_i32_23 : i32
    %36 = arith.extui %35 : i1 to i32
    %c0_i32_24 = arith.constant 0 : i32
    %37 = arith.cmpi ne, %36, %c0_i32_24 : i32
    scf.if %37 {
      %c0_25 = arith.constant 0 : index
      %c0_26 = arith.constant 0 : index
      %38 = vector.load %arg10[%c0_25, %c0_26] : memref<2x1xf32, #tpu.memory_space<vmem>>, vector<2x1xf32>
      %39 = tpu.reciprocal %38 {approx = true} : vector<2x1xf32> -> vector<2x1xf32>
      %c0_27 = arith.constant 0 : index
      %c0_28 = arith.constant 0 : index
      %40 = vector.load %arg11[%c0_27, %c0_28] : memref<2x32xf32, #tpu.memory_space<vmem>>, vector<2x32xf32>
      %41 = vector.broadcast %39 : vector<2x1xf32> to vector<2x32xf32>
      %42 = arith.mulf %40, %41 : vector<2x32xf32>
      %c0_29 = arith.constant 0 : index
      %c0_30 = arith.constant 0 : index
      %43 = vector.load %arg7[%c0_29, %c0_30] : memref<2x32xf32, #tpu.memory_space<vmem>>, vector<2x32xf32>
      tpu.vector_store %arg7[%c0_29, %c0_30], %42 {strides = array<i32>} : memref<2x32xf32, #tpu.memory_space<vmem>>, vector<2x32xf32>,
    } else {
    }
    return
  }
  func.func @transform_0(%arg0: i32, %arg1: i32) -> (i32, i32) {
    %c0_i32 = arith.constant 0 : i32
    %c0_i32_0 = arith.constant 0 : i32
    return %arg0, %c0_i32 : i32, i32
  }
  func.func @transform_1(%arg0: i32, %arg1: i32) -> (i32, i32) {
    %c0_i32 = arith.constant 0 : i32
    %c0_i32_0 = arith.constant 0 : i32
    %c0_i32_1 = arith.constant 0 : i32
    return %c0_i32, %c0_i32_0 : i32, i32
  }
  func.func @transform_2(%arg0: i32, %arg1: i32) -> (i32, i32) {
    %c0_i32 = arith.constant 0 : i32
    %c0_i32_0 = arith.constant 0 : i32
    %c0_i32_1 = arith.constant 0 : i32
    return %c0_i32, %c0_i32_0 : i32, i32
  }
  func.func @transform_3(%arg0: i32, %arg1: i32) -> (i32, i32, i32) {
    %c0_i32 = arith.constant 0 : i32
    %c0_i32_0 = arith.constant 0 : i32
    return %arg0, %arg1, %c0_i32 : i32, i32, i32
  }
  func.func @transform_4(%arg0: i32, %arg1: i32) -> (i32, i32, i32) {
    %c0_i32 = arith.constant 0 : i32
    %c0_i32_0 = arith.constant 0 : i32
    return %arg0, %arg1, %c0_i32 : i32, i32, i32
  }
  func.func @transform_5(%arg0: i32, %arg1: i32) -> (i32, i32) {
    %c0_i32 = arith.constant 0 : i32
    %c0_i32_0 = arith.constant 0 : i32
    return %arg0, %c0_i32 : i32, i32
  }
}

</mosaic_0001>

<bundles_post_ra>
// kernel: tpu_custom_call.1
= control target key start
LH: loop header
LB: loop body
LE: loop exit
PB: predicated region body
PF: predicated region fallthrough
CT: control target
= control target key end

     0   :  { %10 = vsyncpa [#allocation7], 0  ;;  %s673_s0 = inlined_call_operand.hbm [shape: f32[2,16], index: 0, kind: input, shape index: {}]   ;;  %s674_s1 = inlined_call_operand.hbm [shape: f32[16,32], index: 1, kind: input, shape index: {}]   ;;  %s675_s2 = inlined_call_operand.vmem [shape: f32[3,32], index: 2, kind: input, shape index: {}]   ;;  %s676_s3 = inlined_call_operand.hbm [shape: f32[2,8,32], index: 3, kind: input, shape index: {}]   ;;  %s677_s4 = inlined_call_operand.hbm [shape: f32[2,8,32], index: 4, kind: input, shape index: {}]   ;;  %s678_s5 = inlined_call_operand.hbm [shape: f32[2,32], index: 5, kind: output, shape index: {}]  }
   0x1   :  { %11 = vsyncpa [#allocation10], 0 }
   0x2   :  { %12 = vsyncpa [#allocation13], 0 }
   0x3   :  { %13 = vsyncpa [#allocation8], 0  ;;  %s533_s18 = smov [#allocation9]   ;;  %s415_s22 = scalar_lea.hbm %s674_s1, 256 }
   0x4   :  { %s29_s19 = sshll.u32 %s533_s18, 4  ;;  %p416_p0 = scmp.ne.s32.totalorder %s674_s1, %s415_s22  ;;  %s30_s19 = int_to_ptr.vmem [resolvable:$true] %s29_s19 }
   0x5   :  { %p419_p1 = scmp.lt.u32.totalorder %s415_s22, %s674_s1 }
   0x7   :  { %p421_p2 = pnand %p419_p1, %p416_p0 }
   0x9   :  { %424 = shalt.err (!%p421_p2)
}
   0xa   :  { %s425_s27 = scalar_lea.vmem %s30_s19, 256  ;;  %p430_p4 = scmp.lt.s32.totalorder %s30_s19, %s30_s19 }
   0xb   :  { %p426_p3 = scmp.ne.s32.totalorder %s30_s19, %s425_s27  ;;  %p431_p5 = scmp.lt.s32.totalorder %s425_s27, %s425_s27 }
   0xd   :  { %p432_p6 = por %p431_p5, %p430_p4 }
   0xf   :  { %p433_p7 = pnand %p432_p6, %p426_p3 }
  0x11   :  { %436 = shalt.err (!%p433_p7)
}
  0x12   :  { %s534_s28 = smov 128   ;;  %s535_s29 = smov 8  }
  0x13   :  { %35 = dma.hbm_to_vmem [thread:$0]  %s674_s1, 256, %s30_s19, [#allocation10], %s534_s28, %s534_s28, %s535_s29  }
  0x14   :  { %s536_s7 = smov [#allocation6]   ;;  %s537_s9 = smov [#allocation11]  }
  0x15   :  { %s20_s8 = sshll.u32 %s536_s7, 4  ;;  %s43_s10 = sshll.u32 %s537_s9, 4  ;;  %s21_s8 = int_to_ptr.vmem [resolvable:$true] %s20_s8  ;;  %s44_s10 = int_to_ptr.vmem [resolvable:$true] %s43_s10 }
  0x16   :  { %s437_s13 = scalar_lea.hbm %s673_s0, 32 }
  0x17   :  { %p438_p8 = scmp.ne.s32.totalorder %s673_s0, %s437_s13  ;;  %p441_p9 = scmp.lt.u32.totalorder %s437_s13, %s673_s0 }
  0x19   :  { %p443_p10 = pnand %p441_p9, %p438_p8 }
  0x1b   :  { %446 = shalt.err (!%p443_p10)
}
  0x1c   :  { %s447_s1 = scalar_lea.vmem %s21_s8, 32  ;;  %p452_p12 = scmp.lt.s32.totalorder %s21_s8, %s21_s8 }
  0x1d   :  { %p448_p11 = scmp.ne.s32.totalorder %s21_s8, %s447_s1  ;;  %p453_p13 = scmp.lt.s32.totalorder %s447_s1, %s447_s1 }
  0x1f   :  { %p454_p0 = por %p453_p13, %p452_p12 }
  0x21   :  { %p455_p1 = pnand %p454_p0, %p448_p11 }
  0x23   :  { %458 = shalt.err (!%p455_p1)
}
  0x24   :  { %23 = dma.hbm_to_vmem [thread:$0]  %s673_s0, 32, %s21_s8, [#allocation7]  }
  0x25   :  { %s459_s22 = scalar_lea.hbm %s676_s3, 256 }
  0x26   :  { %p460_p2 = scmp.ne.s32.totalorder %s676_s3, %s459_s22  ;;  %p463_p3 = scmp.lt.u32.totalorder %s459_s22, %s676_s3 }
  0x28   :  { %p465_p4 = pnand %p463_p3, %p460_p2 }
  0x2a   :  { %468 = shalt.err (!%p465_p4)
}
  0x2b   :  { %s469_s27 = scalar_lea.vmem %s44_s10, 256  ;;  %p474_p6 = scmp.lt.s32.totalorder %s44_s10, %s44_s10 }
  0x2c   :  { %p470_p5 = scmp.ne.s32.totalorder %s44_s10, %s469_s27  ;;  %p475_p7 = scmp.lt.s32.totalorder %s469_s27, %s469_s27 }
  0x2e   :  { %p476_p8 = por %p475_p7, %p474_p6 }
  0x30   :  { %p477_p9 = pnand %p476_p8, %p470_p5 }
  0x32   :  { %480 = shalt.err (!%p477_p9)
}
  0x33   :  { %49 = dma.hbm_to_vmem [thread:$0]  %s676_s3, 256, %s44_s10, [#allocation10], %s534_s28, %s534_s28, %s535_s29  }
  0x34   :  { %s538_s6 = smov [#allocation12]   ;;  %s481_s11 = scalar_lea.hbm %s677_s4, 256 }
  0x35   :  { %s55_s7 = sshll.u32 %s538_s6, 4  ;;  %p482_p10 = scmp.ne.s32.totalorder %s677_s4, %s481_s11  ;;  %s56_s7 = int_to_ptr.vmem [resolvable:$true] %s55_s7 }
  0x36   :  { %p485_p11 = scmp.lt.u32.totalorder %s481_s11, %s677_s4 }
  0x38   :  { %p487_p12 = pnand %p485_p11, %p482_p10 }
  0x3a   :  { %490 = shalt.err (!%p487_p12)
}
  0x3b   :  { %s491_s16 = scalar_lea.vmem %s56_s7, 256  ;;  %p496_p0 = scmp.lt.s32.totalorder %s56_s7, %s56_s7 }
  0x3c   :  { %p492_p13 = scmp.ne.s32.totalorder %s56_s7, %s491_s16  ;;  %p497_p1 = scmp.lt.s32.totalorder %s491_s16, %s491_s16 }
  0x3e   :  { %p498_p2 = por %p497_p1, %p496_p0 }
  0x40   :  { %p499_p3 = pnand %p498_p2, %p492_p13 }
  0x42   :  { %502 = shalt.err (!%p499_p3)
}
  0x43   :  { %61 = dma.hbm_to_vmem [thread:$0]  %s677_s4, 256, %s56_s7, [#allocation13], %s534_s28, %s534_s28, %s535_s29  }
  0x44   :  { %525 = dma.done.wait [#allocation7], 32  }
  0x45   :  { %526 = vsyncadd [#allocation7], 4294967264 }
  0x46   :  { %527 = dma.done.wait [#allocation10], 512  }
  0x47   :  { %528 = vsyncadd [#allocation10], 4294966784 }
  0x48   :  { %529 = dma.done.wait [#allocation13], 256  }
  0x49   :  { %530 = vsyncadd [#allocation13], 4294967040  ;;  %vm160_vm0 = vcmask 254976   ;;  %v539_v0 = vmov 0.0|0.0   ;;  %vm540_vm1 = vmmov 0   ;;  %v541_v1 = vmov 0.0  }
  0x4a   :  { %387 = vmatprep.subr.bf16.mxu0 %v539_v0  ;;  %384 = vmatprep.mubr.msk.f32.mxu0 %vm540_vm1, %v541_v1  ;;  %vm188_vm2 = vcmask 1024   ;;  %191 = vst.msk [vmem:[#allocation5] sm:$0x3] %vm160_vm0, %v541_v1  ;;  %v542_v2 = vmov -1e+30   ;;  %v79_v3 = vld [vmem:[#allocation9] sm:$0xff]  ;;  %v209_v27 = vlaneseq }
  0x4b   :  { %189 = vst.msk [vmem:[#allocation3] sm:$0x3] %vm188_vm2, %v542_v2  ;;  %190 = vst.msk [vmem:[#allocation4] sm:$0x3] %vm188_vm2, %v541_v1  ;;  %v80_v4 = vld [vmem:[#allocation9 + $0x8] sm:$0xff]  ;;  %vm86_vm3 = vcmask 130048  }
  0x4c   :  { %v388_v5 = vpack.c.bf16 %v80_v4, %v79_v3  ;;  %v78_v6 = vld [vmem:[#allocation6] sm:$0x3]  ;;  %v372_v7 = vld [vmem:[%s675_s2] ss:$0 sm:$0xff]  ;;  %v374_v21 = vld [vmem:[%s675_s2 + $0x1] ss:$0 sm:$0xff] }
  0x4d   :  { %v375_v23 = vld [vmem:[%s675_s2 + $0x2] ss:$0 sm:$0xff]  ;;  %v543_v25 = vmov 1966171168   ;;  %v210_v30 = vshrl.u32 %v209_v27, 7  ;;  %vm232_vm4 = vcmask 261120  }
  0x4e   :  { %389 = vmatpush3.bf16.msra.mxu0 %v388_v5  ;;  %v207_v26 = vunpack.c.l.s4 %v543_v25  ;;  %v193_v36 = vld [vmem:[#allocation11] sm:$0xff]  ;;  %v194_v39 = vld [vmem:[#allocation11 + $0x8] sm:$0xff]  ;;  %v243_v45 = vand.u32 127, %v209_v27  ;;  %vm252_vm5 = vcmask 1041409   ;;  %vm255_vm6 = vcmask 58368   ;;  %s545_s2 = smov [#allocation14]  }
  0x4f   :  { %v222_v32 = vsub.s32 0, %v210_v30  ;;  %v544_v53 = vmov 0   ;;  %v273_v58 = vsub.s32 1, %v210_v30  ;;  %s361_s19 = sshll.u32 %s545_s2, 4  ;;  %s362_s19 = int_to_ptr.vmem [resolvable:$true] %s361_s19 }
  0x50   :  { %v208_v29 = vunpack.c.0.s8 %v207_v26  ;;  %v246_v47 = vsub.s32 %v243_v45, %v210_v30  ;;  %403 = vset.pattern.permute.xlu1 %v544_v53  ;;  %404 = vset.pattern.permute.xlu0 %v544_v53  ;;  %s503_s20 = scalar_lea.vmem %s362_s19, 32  ;;  %p508_p5 = scmp.lt.s32.totalorder %s362_s19, %s362_s19 }
  0x51   :  { %385 = vmatmul.mubr.msk.f32.vlgmr.msra.gmra.mrb[0].mxu0 %vm86_vm3, %v78_v6  ;;  %v195_v6 = vld [vmem:[#allocation12] sm:$0xff]  ;;  %p504_p4 = scmp.ne.s32.totalorder %s362_s19, %s503_s20  ;;  %p509_p6 = scmp.lt.s32.totalorder %s503_s20, %s503_s20 }
  0x52   :  { %v211_v31 = vsub.s32 %v208_v29, %v210_v30  ;;  %v239_v54 = vld [vmem:[#allocation3] sm:$0x3] }
  0x53   :  { %p510_p7 = por %p509_p6, %p508_p5 }
  0x55   :  { %p511_p8 = pnand %p510_p7, %p504_p4 }
 0x124   :  { %v156_v8 = vpop.f32.mrb[0].mxu0 }
 0x125   :  { %v157_v9 = vadd.f32 %v372_v7, %v156_v8  ;;  %v386_v10 = vpop.f32.mrb[1].mxu0  ;;  %v196_v7 = vld [vmem:[#allocation12 + $0x8] sm:$0xff] }
 0x127   :  { %v161_v11 = vsel %vm160_vm0, %v157_v9, 0.0 }
 0x128   :  { %162 = vadd.xlane.f32.xlu0 %v161_v11 }
 0x1b5   :  { %v163_v12 = vpop.xlane.xlu0 %162 }
 0x1b6   :  { %v165_v13 = vmul.f32 0.03125, %v163_v12 }
 0x1b8   :  { %v166_v14 = vsub.f32 %v157_v9, %v165_v13 }
 0x1ba   :  { %v167_v15 = vmul.f32 %v166_v14, %v166_v14 }
 0x1bc   :  { %v168_v16 = vsel %vm160_vm0, %v167_v15, 0.0 }
 0x1bd   :  { %169 = vadd.xlane.f32.xlu0 %v168_v16 }
 0x24a   :  { %v170_v17 = vpop.xlane.xlu0 %169 }
 0x24b   :  { %v171_v18 = vmul.f32 0.03125, %v170_v17 }
 0x24d   :  { %v172_v19 = vadd.f32 1e-05, %v171_v18 }
 0x24f   :  { %405 = vrsqrt.f32 %v172_v19 }
 0x259   :  { %v406_v20 = vpop.eup %405 }
 0x25a   :  { %v174_v22 = vmul.f32 %v406_v20, %v166_v14 }
 0x25c   :  { %v180_v24 = vmul.f32 %v374_v21, %v174_v22 }
 0x25e   :  { %v186_v28 = vadd.f32 %v375_v23, %v180_v24 }
 0x260   :  { %187 = vst.msk [vmem:[#allocation2] sm:$0x3] %vm160_vm0, %v186_v28  ;;  %v309_v28 = vld [vmem:[#allocation5] sm:$0x3] }
 0x267   :  { %v376_v33 = vld.sshfl [vmem:[#allocation2] sm:$0x11 pattern:$0x75316420] }
 0x268   :  { %v212_v34 = vrot.slane %v376_v33, %v211_v31  ;;  %v205_v35 = vcombine.high %v376_v33, %v376_v33 }
 0x26a   :  { %v223_v37 = vrot.slane %v212_v34, %v222_v32  ;;  %v219_v38 = vrot.slane %v205_v35, %v211_v31  ;;  %v283_v35 = vld [vmem:[#allocation4] sm:$0x3] }
 0x26c   :  { %v230_v40 = vmul.f32 %v223_v37, %v193_v36  ;;  %v227_v41 = vrot.slane %v219_v38, %v222_v32 }
 0x26e   :  { %v233_v42 = vsel %vm232_vm4, %v230_v40, 0.0  ;;  %v231_v43 = vmul.f32 %v227_v41, %v194_v39 }
 0x26f   :  { %234 = vadd.xlane.f32.xlu1 %v233_v42 }
 0x270   :  { %v236_v44 = vsel %vm232_vm4, %v231_v43, 0.0 }
 0x273   :  { %237 = vadd.xlane.f32.xlu1 %v236_v44 }
 0x2fc   :  { %v235_v46 = vpop.xlane.xlu1 %234 }
 0x2fd   :  { %v247_v49 = vrot.slane %v235_v46, %v246_v47 }
 0x300   :  { %v238_v48 = vpop.xlane.xlu1 %237 }
 0x301   :  { %v251_v50 = vrot.slane %v238_v48, %v246_v47 }
 0x303   :  { %v253_v51 = vsel %vm252_vm5, %v251_v50, %v247_v49 }
 0x304   :  { %v256_v52 = vsel %vm255_vm6, %v253_v51, -inf }
 0x305   :  { %257 = vmax.xlane.f32.xlu0 %v256_v52 }
 0x392   :  { %v258_v55 = vpop.xlane.xlu0 %257 }
 0x393   :  { %v259_v56 = vmax.f32 %v239_v54, %v258_v55 }
 0x395   :  { %v260_v57 = vsub.f32 %v239_v54, %v259_v56  ;;  %341 = vst.msk [vmem:[#allocation3] sm:$0x3] %vm188_vm2, %v259_v56  ;;  %265 = vperm.xlu1 %403, %v259_v56  }
 0x397   :  { %v261_v2 = vmul.f32 1.442695, %v260_v57 }
 0x414   :  { %v266_v59 = vpop.permute.xlu1 %265 }
 0x415   :  { %v270_v60 = vrot.slane %v266_v59, %v222_v32  ;;  %v274_v61 = vrot.slane %v266_v59, %v273_v58 }
 0x417   :  { %v277_v62 = vsub.f32 %v235_v46, %v270_v60  ;;  %v278_v63 = vsub.f32 %v238_v48, %v274_v61 }
 0x419   :  { %v279_v0 = vmul.f32 1.442695, %v277_v62  ;;  %v281_v1 = vmul.f32 1.442695, %v278_v63 }
 0x41b   :  { %407 = vpow2.f32 %v279_v0 }
 0x41c   :  { %409 = vpow2.f32 %v281_v1 }
 0x41d   :  { %411 = vpow2.f32 %v261_v2 }
 0x425   :  { %v408_v3 = vpop.eup %407 }
 0x426   :  { %v410_v4 = vpop.eup %409  ;;  %288 = vperm.xlu0 %404, %v408_v3  }
 0x427   :  { %291 = vperm.xlu1 %403, %v410_v4   ;;  %v412_v5 = vpop.eup %411 }
 0x428   :  { %v284_v36 = vmul.f32 %v412_v5, %v283_v35 }
 0x42a   :  { %312 = vperm.xlu0 %404, %v412_v5  }
 0x4a5   :  { %v289_v8 = vpop.permute.xlu0 %288 }
 0x4a6   :  { %v292_v9 = vpop.permute.xlu1 %291  ;;  %v296_v10 = vrot.slane %v289_v8, %v246_v47  ;;  %v318_v11 = vmul.f32 %v289_v8, %v195_v6 }
 0x4a7   :  { %v300_v12 = vrot.slane %v292_v9, %v246_v47  ;;  %v319_v13 = vmul.f32 %v292_v9, %v196_v7 }
 0x4a8   :  { %v320_v14 = vsel %vm232_vm4, %v318_v11, 0.0 }
 0x4a9   :  { %v327_v15 = vsel %vm232_vm4, %v319_v13, 0.0  ;;  %v321_v16 = vrot.slane %v320_v14, 4  ;;  %v301_v17 = vsel %vm252_vm5, %v300_v12, %v296_v10  ;;  %v313_v29 = vpop.permute.xlu0 %312 }
 0x4aa   :  { %v328_v18 = vrot.slane %v327_v15, 4  ;;  %v303_v19 = vsel %vm255_vm6, %v301_v17, 0.0  ;;  %v315_v32 = vmul.f32 %v313_v29, %v309_v28 }
 0x4ab   :  { %v322_v20 = vadd.f32 %v321_v16, %v320_v14  ;;  %304 = vadd.xlane.f32.xlu1 %v303_v19 }
 0x4ac   :  { %v329_v21 = vadd.f32 %v328_v18, %v327_v15 }
 0x4ad   :  { %v323_v22 = vrot.slane %v322_v20, 2 }
 0x4ae   :  { %v330_v23 = vrot.slane %v329_v21, 2 }
 0x4af   :  { %v324_v24 = vadd.f32 %v323_v22, %v322_v20 }
 0x4b0   :  { %v331_v25 = vadd.f32 %v330_v23, %v329_v21 }
 0x4b1   :  { %v325_v26 = vrot.slane %v324_v24, 1 }
 0x4b2   :  { %v332_v27 = vrot.slane %v331_v25, 1 }
 0x4b3   :  { %v326_v30 = vadd.f32 %v325_v26, %v324_v24 }
 0x4b4   :  { %v333_v31 = vadd.f32 %v332_v27, %v331_v25 }
 0x4b6   :  { %v336_v33 = vsel %vm252_vm5, %v333_v31, %v326_v30 }
 0x4b7   :  { %v338_v34 = vadd.f32 %v336_v33, %v315_v32 }
 0x4b9   :  { %340 = vst.msk [vmem:[#allocation5] sm:$0x3] %vm160_vm0, %v338_v34 }
 0x4c0   :  { %v347_v41 = vld [vmem:[#allocation5] sm:$0x3] }
 0x538   :  { %v305_v37 = vpop.xlane.xlu1 %304 }
 0x539   :  { %v306_v38 = vadd.f32 %v305_v37, %v284_v36 }
 0x53b   :  { %308 = vst.msk [vmem:[#allocation4] sm:$0x3] %vm188_vm2, %v306_v38 }
 0x542   :  { %v345_v39 = vld [vmem:[#allocation4] sm:$0x3] }
 0x543   :  { %413 = vrcp.f32 %v345_v39 }
 0x54d   :  { %v414_v40 = vpop.eup %413 }
 0x54e   :  { %350 = vperm.xlu0 %404, %v414_v40  }
 0x5cd   :  { %v351_v42 = vpop.permute.xlu0 %350 }
 0x5ce   :  { %v353_v43 = vmul.f32 %v351_v42, %v347_v41 }
 0x5d0   :  { %354 = vst.msk [vmem:[#allocation14] sm:$0x3] %vm160_vm0, %v353_v43 }
 0x5d1   :  { %514 = shalt.err (!%p511_p8)
}
 0x5d2   :  { %s515_s23 = scalar_lea.hbm %s678_s5, 32 }
 0x5d3   :  { %p516_p9 = scmp.ne.s32.totalorder %s678_s5, %s515_s23  ;;  %p519_p10 = scmp.lt.u32.totalorder %s515_s23, %s678_s5 }
 0x5d5   :  { %p521_p11 = pnand %p519_p10, %p516_p9 }
 0x5d7   :  { %524 = shalt.err (!%p521_p11)
}
 0x5d8   :  { %364 = dma.vmem_to_hbm [thread:$0]  %s362_s19, 32, %s678_s5, [#allocation8]  }
 0x5d9   :  { %531 = dma.done.wait [#allocation8], 32  }
 0x5da   :  { %532 = vsyncadd [#allocation8], 4294967264 }
 0x5db   :  { %368 = vsyncpa [#allocation7], 1 }
 0x5dc   :  { %369 = vsyncpa [#allocation10], 1 }
 0x5dd   :  { %370 = vsyncpa [#allocation13], 1 }
 0x5de   :  { %371 = vsyncpa [#allocation8], 1 }

</bundles_post_ra>
